<compile_context>
chip_gen: v6e
topology: v6e:2x2x1
jax: 0.10.0
libtpu: 0.0.40
codegen_flags: <defaults>
</compile_context>

<pallas_src>
import jax
import jax.numpy as jnp
from jax.experimental import pallas as pl
from jax.experimental.pallas import tpu as pltpu

D_IN, D_H1, D_H2 = 768, 512, 64
D_OUT = 128  # lane-dense fused tail: cols 0-5 = h, col 6 = s, cols 7-127 = 0


def _round_up(x, m):
    return ((x + m - 1) // m) * m


def _head_kernel(x_ref, w1_ref, b1_ref, w2_ref, b2_ref, w3_ref, b3_ref, out_ref):
    # In-kernel bf16 cast of the f32 input tile (VPU has slack; saves an HBM pass).
    x = x_ref[...].astype(jnp.bfloat16)                                  # [TB, 768]

    # tronc: Linear(768,512) + ReLU   (bf16 MXU, f32 accumulate)
    t1 = jnp.dot(x, w1_ref[...], preferred_element_type=jnp.float32) + b1_ref[...]
    t1 = jnp.maximum(t1, 0.0).astype(jnp.bfloat16)                       # [TB, 512]

    # tronc: Linear(512,64) + ReLU
    t2 = jnp.dot(t1, w2_ref[...], preferred_element_type=jnp.float32) + b2_ref[...]
    t2 = jnp.maximum(t2, 0.0)                                            # [TB, 64] f32

    # Fused tail (f32, negligible FLOPs): cols 0-5 = h = t2@Wh + bh,
    # col 6 = s = t2@(Wsx + Wh@Wsh) + (bs + bh@Wsh), cols 7-127 = 0 (lane pad).
    out_ref[...] = (jnp.dot(t2, w3_ref[...], preferred_element_type=jnp.float32)
                    + b3_ref[...])                                       # [TB, 128]


def _choose_tile(B, block_b):
    """Pick the batch tile so (a) small batches run as one full-extent block
    with no padding, (b) medium batches split in two for v7x megacore,
    (c) large batches stream block_b-row tiles."""
    if B <= block_b:
        if B > 256:
            tb = _round_up(-(-B // 2), 8)    # two tiles -> both v7x TensorCores
        else:
            tb = B                           # single full-extent block, no pad
    else:
        tb = max(8, _round_up(block_b, 8))
    bp = _round_up(B, tb)
    return tb, bp


def heuristic_bert_classifier_head(cls_emb, fused_params, *, block_b=1024):
    """cls_emb: [B, 768] float32 CLS embedding. Returns (s [B,1], h [B,6])."""
    B = cls_emb.shape[0]
    w1, b1, w2, b2, w3, b3 = fused_params

    tb, bp = _choose_tile(B, block_b)
    nb = bp // tb

    x = cls_emb
    if bp != B:  # only pay the pad pass when B is not tile-divisible
        x = jnp.pad(x, ((0, bp - B), (0, 0)))

    def const_spec(a):
        return pl.BlockSpec(a.shape, lambda i: (0, 0))

    flops = 2 * bp * (D_IN * D_H1 + D_H1 * D_H2 + D_H2 * D_OUT)
    bytes_accessed = (bp * D_IN * 4                                      # f32 input
                      + (D_IN * D_H1 + D_H1 * D_H2) * 2                  # bf16 weights
                      + D_H2 * D_OUT * 4                                 # f32 tail weight
                      + (D_H1 + D_H2 + D_OUT) * 4                        # f32 biases
                      + bp * D_OUT * 4)                                  # f32 output

    out = pl.pallas_call(
        _head_kernel,
        grid=(nb,),
        out_shape=jax.ShapeDtypeStruct((bp, D_OUT), jnp.float32),
        in_specs=[
            pl.BlockSpec((tb, D_IN), lambda i: (i, 0)),   # pipelined input tiles
            const_spec(w1), const_spec(b1),               # VMEM-resident weights
            const_spec(w2), const_spec(b2),
            const_spec(w3), const_spec(b3),
        ],
        out_specs=pl.BlockSpec((tb, D_OUT), lambda i: (i, 0)),  # lane-dense store
        compiler_params=pltpu.CompilerParams(dimension_semantics=("parallel",)),
        cost_estimate=pl.CostEstimate(flops=flops, transcendentals=0,
                                      bytes_accessed=bytes_accessed),
    )(x, w1, b1, w2, b2, w3, b3)

    s = out[:B, 6:7]
    h = out[:B, 0:6]
    return s, h


def _linear_params(key, fan_in, fan_out):
    """PyTorch nn.Linear default init: U(-1/sqrt(fan_in), 1/sqrt(fan_in)).
    W returned as [fan_in, fan_out] (transposed from torch's [out, in])."""
    kw, kb = jax.random.split(key)
    bound = 1.0 / jnp.sqrt(jnp.float32(fan_in))
    w = jax.random.uniform(kw, (fan_in, fan_out), jnp.float32, -bound, bound)
    b = jax.random.uniform(kb, (1, fan_out), jnp.float32, -bound, bound)
    return w, b


def make_params(key):
    k1, k2, k3, k4 = jax.random.split(key, 4)
    w1, b1 = _linear_params(k1, D_IN, D_H1)    # tronc[0]
    w2, b2 = _linear_params(k2, D_H1, D_H2)    # tronc[2]
    wh, bh = _linear_params(k3, D_H2, 6)       # self.h
    ws, bs = _linear_params(k4, 70, 1)         # self.s (acts on concat([x, h]))
    wsx, wsh = ws[:D_H2, :], ws[D_H2:, :]

    # Fold the tail in f32 and keep it f32:
    #   s = t2@wsx + (t2@wh + bh)@wsh + bs = t2@(wsx + wh@wsh) + (bs + bh@wsh)
    w_s_col = wsx + wh @ wsh                                           # [64, 1]
    b_s = bs + bh @ wsh                                                # [1, 1]
    lane_pad = D_OUT - 7
    w3 = jnp.concatenate(
        [wh, w_s_col, jnp.zeros((D_H2, lane_pad), jnp.float32)], axis=1)   # [64, 128]
    b3 = jnp.concatenate(
        [bh, b_s, jnp.zeros((1, lane_pad), jnp.float32)], axis=1)          # [1, 128]

    fused = (w1.astype(jnp.bfloat16), b1,
             w2.astype(jnp.bfloat16), b2,
             w3, b3)
    raw = (w1, b1, w2, b2, wh, bh, wsx, wsh, bs)
    return fused, raw


def _reference(cls_emb, raw_params):
    """Pure f32 reference mirroring the original PyTorch forward exactly."""
    (w1, b1, w2, b2, wh, bh, wsx, wsh, bs) = raw_params
    t = jnp.maximum(cls_emb @ w1 + b1, 0.0)
    t = jnp.maximum(t @ w2 + b2, 0.0)
    h = t @ wh + bh
    s = jnp.concatenate([t, h], axis=1) @ jnp.concatenate([wsx, wsh], axis=0) + bs
    return s, h


if __name__ == "__main__":
    key = jax.random.PRNGKey(0)
    k_params, k_x1, k_x2 = jax.random.split(key, 3)
    fused, raw = make_params(k_params)

    # --- Test 1: tiny batch (stand-in for bert(...).last_hidden_state[:, 0, :]) ---
    B = 2
    cls_emb = jax.random.normal(k_x1, (B, D_IN), dtype=jnp.float32)
    s, h = heuristic_bert_classifier_head(cls_emb, fused)
    s = jax.block_until_ready(s)
    h = jax.block_until_ready(h)
    s_ref, h_ref = _reference(cls_emb, raw)
    assert s.shape == (B, 1) and h.shape == (B, 6)
    assert jnp.allclose(s, s_ref, atol=5e-2, rtol=5e-2)   # bf16 tolerance
    assert jnp.allclose(h, h_ref, atol=5e-2, rtol=5e-2)

    # --- Test 2: multi-tile batch grid with padding (exercises pipelining) ---
    B2 = 40
    cls_emb2 = jax.random.normal(k_x2, (B2, D_IN), dtype=jnp.float32)
    s2, h2 = heuristic_bert_classifier_head(cls_emb2, fused, block_b=16)
    s2 = jax.block_until_ready(s2)
    h2 = jax.block_until_ready(h2)
    s2_ref, h2_ref = _reference(cls_emb2, raw)
    assert s2.shape == (B2, 1) and h2.shape == (B2, 6)
    assert jnp.allclose(s2, s2_ref, atol=5e-2, rtol=5e-2)
    assert jnp.allclose(h2, h2_ref, atol=5e-2, rtol=5e-2)

    print("KERNEL_OK")
</pallas_src>

<mosaic_0001>
module attributes {stable_mosaic.version = 11 : i64} {
  func.func @_head_kernel(%arg0: i32, %arg1: memref<2x768xf32, #tpu.memory_space<vmem>>, %arg2: memref<768x512xbf16, #tpu.memory_space<vmem>>, %arg3: memref<1x512xf32, #tpu.memory_space<vmem>>, %arg4: memref<512x64xbf16, #tpu.memory_space<vmem>>, %arg5: memref<1x64xf32, #tpu.memory_space<vmem>>, %arg6: memref<64x128xf32, #tpu.memory_space<vmem>>, %arg7: memref<1x128xf32, #tpu.memory_space<vmem>>, %arg8: memref<2x128xf32, #tpu.memory_space<vmem>>) attributes {dimension_semantics = [#tpu.dimension_semantics<parallel>], iteration_bounds = array<i64: 1>, scalar_prefetch = 0 : i64, scratch_operands = 0 : i64, tpu.core_type = #tpu.core_type<tc>, window_params = [{transform_indices = @transform_0, window_bounds = array<i64: 2, 768>}, {pipeline_mode = #tpu.pipeline_mode<synchronous>, transform_indices = @transform_1, window_bounds = array<i64: 768, 512>}, {pipeline_mode = #tpu.pipeline_mode<synchronous>, transform_indices = @transform_2, window_bounds = array<i64: 1, 512>}, {pipeline_mode = #tpu.pipeline_mode<synchronous>, transform_indices = @transform_3, window_bounds = array<i64: 512, 64>}, {pipeline_mode = #tpu.pipeline_mode<synchronous>, transform_indices = @transform_4, window_bounds = array<i64: 1, 64>}, {pipeline_mode = #tpu.pipeline_mode<synchronous>, transform_indices = @transform_5, window_bounds = array<i64: 64, 128>}, {pipeline_mode = #tpu.pipeline_mode<synchronous>, transform_indices = @transform_6, window_bounds = array<i64: 1, 128>}, {transform_indices = @transform_7, window_bounds = array<i64: 2, 128>}]} {
    %c0 = arith.constant 0 : index
    %c0_0 = arith.constant 0 : index
    %0 = vector.load %arg1[%c0, %c0_0] : memref<2x768xf32, #tpu.memory_space<vmem>>, vector<2x768xf32>
    %1 = arith.truncf %0 : vector<2x768xf32> to vector<2x768xbf16>
    %c0_1 = arith.constant 0 : index
    %c0_2 = arith.constant 0 : index
    %2 = vector.load %arg2[%c0_1, %c0_2] : memref<768x512xbf16, #tpu.memory_space<vmem>>, vector<768x512xbf16>
    %cst = arith.constant dense<0.000000e+00> : vector<2x512xf32>
    %3 = tpu.matmul %1, %2, %cst {dimension_numbers = #tpu.dot_dimension_numbers<[1], [0], [0], [1], [0, 0, 1, 1], [], []>} : vector<2x768xbf16>, vector<768x512xbf16>, vector<2x512xf32> -> vector<2x512xf32>
    %c0_3 = arith.constant 0 : index
    %c0_4 = arith.constant 0 : index
    %4 = vector.load %arg3[%c0_3, %c0_4] : memref<1x512xf32, #tpu.memory_space<vmem>>, vector<1x512xf32>
    %5 = vector.broadcast %4 : vector<1x512xf32> to vector<2x512xf32>
    %6 = arith.addf %3, %5 : vector<2x512xf32>
    %cst_5 = arith.constant 0.000000e+00 : f32
    %7 = vector.broadcast %cst_5 : f32 to vector<2x512xf32>
    %8 = arith.maximumf %6, %7 : vector<2x512xf32>
    %9 = arith.truncf %8 : vector<2x512xf32> to vector<2x512xbf16>
    %c0_6 = arith.constant 0 : index
    %c0_7 = arith.constant 0 : index
    %10 = vector.load %arg4[%c0_6, %c0_7] : memref<512x64xbf16, #tpu.memory_space<vmem>>, vector<512x64xbf16>
    %cst_8 = arith.constant dense<0.000000e+00> : vector<2x64xf32>
    %11 = tpu.matmul %9, %10, %cst_8 {dimension_numbers = #tpu.dot_dimension_numbers<[1], [0], [0], [1], [0, 0, 1, 1], [], []>} : vector<2x512xbf16>, vector<512x64xbf16>, vector<2x64xf32> -> vector<2x64xf32>
    %c0_9 = arith.constant 0 : index
    %c0_10 = arith.constant 0 : index
    %12 = vector.load %arg5[%c0_9, %c0_10] : memref<1x64xf32, #tpu.memory_space<vmem>>, vector<1x64xf32>
    %13 = vector.broadcast %12 : vector<1x64xf32> to vector<2x64xf32>
    %14 = arith.addf %11, %13 : vector<2x64xf32>
    %cst_11 = arith.constant 0.000000e+00 : f32
    %15 = vector.broadcast %cst_11 : f32 to vector<2x64xf32>
    %16 = arith.maximumf %14, %15 : vector<2x64xf32>
    %c0_12 = arith.constant 0 : index
    %c0_13 = arith.constant 0 : index
    %17 = vector.load %arg6[%c0_12, %c0_13] : memref<64x128xf32, #tpu.memory_space<vmem>>, vector<64x128xf32>
    %cst_14 = arith.constant dense<0.000000e+00> : vector<2x128xf32>
    %18 = tpu.matmul %16, %17, %cst_14 {dimension_numbers = #tpu.dot_dimension_numbers<[1], [0], [0], [1], [0, 0, 1, 1], [], []>} : vector<2x64xf32>, vector<64x128xf32>, vector<2x128xf32> -> vector<2x128xf32>
    %c0_15 = arith.constant 0 : index
    %c0_16 = arith.constant 0 : index
    %19 = vector.load %arg7[%c0_15, %c0_16] : memref<1x128xf32, #tpu.memory_space<vmem>>, vector<1x128xf32>
    %20 = vector.broadcast %19 : vector<1x128xf32> to vector<2x128xf32>
    %21 = arith.addf %18, %20 : vector<2x128xf32>
    %c0_17 = arith.constant 0 : index
    %c0_18 = arith.constant 0 : index
    %22 = vector.load %arg8[%c0_17, %c0_18] : memref<2x128xf32, #tpu.memory_space<vmem>>, vector<2x128xf32>
    tpu.vector_store %arg8[%c0_17, %c0_18], %21 {strides = array<i32>} : memref<2x128xf32, #tpu.memory_space<vmem>>, vector<2x128xf32>,
    return
  }
  func.func @transform_0(%arg0: i32) -> (i32, i32) {
    %c0_i32 = arith.constant 0 : i32
    %c0_i32_0 = arith.constant 0 : i32
    return %arg0, %c0_i32 : i32, i32
  }
  func.func @transform_1(%arg0: i32) -> (i32, i32) {
    %c0_i32 = arith.constant 0 : i32
    %c0_i32_0 = arith.constant 0 : i32
    %c0_i32_1 = arith.constant 0 : i32
    return %c0_i32, %c0_i32_0 : i32, i32
  }
  func.func @transform_2(%arg0: i32) -> (i32, i32) {
    %c0_i32 = arith.constant 0 : i32
    %c0_i32_0 = arith.constant 0 : i32
    %c0_i32_1 = arith.constant 0 : i32
    return %c0_i32, %c0_i32_0 : i32, i32
  }
  func.func @transform_3(%arg0: i32) -> (i32, i32) {
    %c0_i32 = arith.constant 0 : i32
    %c0_i32_0 = arith.constant 0 : i32
    %c0_i32_1 = arith.constant 0 : i32
    return %c0_i32, %c0_i32_0 : i32, i32
  }
  func.func @transform_4(%arg0: i32) -> (i32, i32) {
    %c0_i32 = arith.constant 0 : i32
    %c0_i32_0 = arith.constant 0 : i32
    %c0_i32_1 = arith.constant 0 : i32
    return %c0_i32, %c0_i32_0 : i32, i32
  }
  func.func @transform_5(%arg0: i32) -> (i32, i32) {
    %c0_i32 = arith.constant 0 : i32
    %c0_i32_0 = arith.constant 0 : i32
    %c0_i32_1 = arith.constant 0 : i32
    return %c0_i32, %c0_i32_0 : i32, i32
  }
  func.func @transform_6(%arg0: i32) -> (i32, i32) {
    %c0_i32 = arith.constant 0 : i32
    %c0_i32_0 = arith.constant 0 : i32
    %c0_i32_1 = arith.constant 0 : i32
    return %c0_i32, %c0_i32_0 : i32, i32
  }
  func.func @transform_7(%arg0: i32) -> (i32, i32) {
    %c0_i32 = arith.constant 0 : i32
    %c0_i32_0 = arith.constant 0 : i32
    return %arg0, %c0_i32 : i32, i32
  }
}

</mosaic_0001>

<bundles_post_ra>
// kernel: tpu_custom_call.1
= control target key start
LH: loop header
LB: loop body
LE: loop exit
PB: predicated region body
PF: predicated region fallthrough
CT: control target
= control target key end

     0   :  { %12 = vsyncpa [#allocation3], 0  ;;  %s2853_s0 = inlined_call_operand.vmem [shape: f32[2,768], index: 0, kind: input, shape index: {}]   ;;  %s2854_s1 = inlined_call_operand.hbm [shape: bf16[768,512], index: 1, kind: input, shape index: {}]   ;;  %s2855_s2 = inlined_call_operand.vmem [shape: f32[1,512], index: 2, kind: input, shape index: {}]   ;;  %s2856_s3 = inlined_call_operand.vmem [shape: bf16[512,64], index: 3, kind: input, shape index: {}]   ;;  %s2857_s4 = inlined_call_operand.vmem [shape: f32[1,64], index: 4, kind: input, shape index: {}]   ;;  %s2858_s5 = inlined_call_operand.vmem [shape: f32[64,128], index: 5, kind: input, shape index: {}]   ;;  %s2859_s6 = inlined_call_operand.vmem [shape: f32[1,128], index: 6, kind: input, shape index: {}]   ;;  %s2860_s7 = inlined_call_operand.hbm [shape: f32[2,128], index: 7, kind: output, shape index: {}]  }
   0x1   :  { %13 = vsyncpa [#allocation4], 0  ;;  %s2632_s24 = smov [#allocation2]  }
   0x2   :  { %s21_s25 = sshll.u32 %s2632_s24, 4  ;;  %s22_s25 = int_to_ptr.vmem [resolvable:$true] %s21_s25 }
   0x3   :  { %s2596_s26 = scalar_lea.vmem %s22_s25, 24576  ;;  %p2601_p1 = scmp.lt.s32.totalorder %s22_s25, %s22_s25 }
   0x4   :  { %p2597_p0 = scmp.ne.s32.totalorder %s22_s25, %s2596_s26  ;;  %p2602_p2 = scmp.lt.s32.totalorder %s2596_s26, %s2596_s26 }
   0x6   :  { %p2603_p3 = por %p2602_p2, %p2601_p1 }
   0x8   :  { %p2604_p4 = pnand %p2603_p3, %p2597_p0 }
   0xa   :  { %2607 = shalt.err (!%p2604_p4)
}
   0xb   :  { %s2633_s27 = smov 256   ;;  %s2634_s28 = smov 16  }
   0xc   :  { %27 = dma.hbm_to_vmem [thread:$0]  %s2854_s1, 24576, %s22_s25, [#allocation3], %s2633_s27, %s2633_s27, %s2634_s28  }
   0xd   :  { %2628 = dma.done.wait [#allocation3], 24576  }
   0xe   :  { %2629 = vsyncadd [#allocation3], 4294942720  ;;  %v2267_v0 = vld [vmem:[#allocation2 + $0xe4] ss:$16 sps:$4 sm:$0xff]   ;;  %v2271_v2 = vld [vmem:[#allocation2 + $0xe0] ss:$16 sps:$4 sm:$0xff]   ;;  %v50_v38 = vlaneseq }
   0xf   :  { %v2269_v1 = vld [vmem:[#allocation2 + $0x2e4] ss:$16 sps:$4 sm:$0xff]   ;;  %1257 = vmatprep.subr.bf16.mxu0 %v2267_v0  ;;  %v2272_v3 = vld [vmem:[#allocation2 + $0x2e0] ss:$16 sps:$4 sm:$0xff]   ;;  %v2635_v36 = vmov 1983009808  }
  0x10   :  { %1298 = vmatprep.subr.bf16.mxu1 %v2269_v1  ;;  %v2273_v4 = vld [vmem:[#allocation2 + $0xc4] ss:$16 sps:$4 sm:$0xff]   ;;  %1258 = vmatpush1.bf16.msra.mxu0 %v2271_v2  ;;  %v2277_v6 = vld [vmem:[#allocation2 + $0xc0] ss:$16 sps:$4 sm:$0xff]   ;;  %v48_v37 = vunpack.c.l.s4 %v2635_v36  ;;  %v2682_v43 = vshrl.u32 %v50_v38, 7  ;;  %vm2637_vm0 = vmmov 0  }
  0x11   :  { %1299 = vmatpush1.bf16.msra.mxu1 %v2272_v3  ;;  %v2275_v5 = vld [vmem:[#allocation2 + $0x2c4] ss:$16 sps:$4 sm:$0xff]   ;;  %1259 = vmatprep.subr.bf16.mxu0 %v2273_v4  ;;  %v2278_v7 = vld [vmem:[#allocation2 + $0x2c0] ss:$16 sps:$4 sm:$0xff]   ;;  %vm1870_vm1 = vcmask 523264   ;;  %s2638_s18 = smov [#allocation5]  }
  0x12   :  { %1300 = vmatprep.subr.bf16.mxu1 %v2275_v5  ;;  %v2279_v8 = vld [vmem:[#allocation2 + $0xa4] ss:$16 sps:$4 sm:$0xff]   ;;  %v2283_v10 = vld [vmem:[#allocation2 + $0xa0] ss:$16 sps:$4 sm:$0xff]   ;;  %v49_v42 = vunpack.c.0.s8 %v48_v37  ;;  %v2399_v37 = vld [vmem:[#allocation2 + $0x4c] ss:$16 sps:$4 sm:$0xff]  }
  0x13   :  { %v2281_v9 = vld [vmem:[#allocation2 + $0x2a4] ss:$16 sps:$4 sm:$0xff]   ;;  %v2284_v11 = vld [vmem:[#allocation2 + $0x2a0] ss:$16 sps:$4 sm:$0xff]   ;;  %s1951_s19 = sshll.u32 %s2638_s18, 4  ;;  %s1952_s19 = int_to_ptr.vmem [resolvable:$true] %s1951_s19 }
  0x14   :  { %1260 = vmatpush1.bf16.msra.mxu0 %v2277_v6  ;;  %v2285_v12 = vld [vmem:[#allocation2 + $0x84] ss:$16 sps:$4 sm:$0xff]   ;;  %v2289_v14 = vld [vmem:[#allocation2 + $0x80] ss:$16 sps:$4 sm:$0xff]   ;;  %v52_v49 = vsub.s32 %v49_v42, %v2682_v43  ;;  %p2613_p6 = scmp.lt.s32.totalorder %s1952_s19, %s1952_s19 }
  0x15   :  { %1301 = vmatpush1.bf16.msra.mxu1 %v2278_v7  ;;  %1261 = vmatprep.subr.bf16.mxu0 %v2279_v8  ;;  %v2287_v13 = vld [vmem:[#allocation2 + $0x284] ss:$16 sps:$4 sm:$0xff]   ;;  %v2290_v15 = vld [vmem:[#allocation2 + $0x280] ss:$16 sps:$4 sm:$0xff]  }
  0x16   :  { %1302 = vmatprep.subr.bf16.mxu1 %v2281_v9  ;;  %v2291_v16 = vld [vmem:[#allocation2 + $0x64] ss:$16 sps:$4 sm:$0xff]   ;;  %v2295_v18 = vld [vmem:[#allocation2 + $0x60] ss:$16 sps:$4 sm:$0xff]  }
  0x17   :  { %v2293_v17 = vld [vmem:[#allocation2 + $0x264] ss:$16 sps:$4 sm:$0xff]   ;;  %v2296_v19 = vld [vmem:[#allocation2 + $0x260] ss:$16 sps:$4 sm:$0xff]  }
  0x18   :  { %1262 = vmatpush1.bf16.msra.mxu0 %v2283_v10  ;;  %v2297_v20 = vld [vmem:[#allocation2 + $0x44] ss:$16 sps:$4 sm:$0xff]   ;;  %v2301_v22 = vld [vmem:[#allocation2 + $0x40] ss:$16 sps:$4 sm:$0xff]  }
  0x19   :  { %1303 = vmatpush1.bf16.msra.mxu1 %v2284_v11  ;;  %1263 = vmatprep.subr.bf16.mxu0 %v2285_v12  ;;  %v2299_v21 = vld [vmem:[#allocation2 + $0x244] ss:$16 sps:$4 sm:$0xff]   ;;  %v2302_v23 = vld [vmem:[#allocation2 + $0x240] ss:$16 sps:$4 sm:$0xff]  }
  0x1a   :  { %1304 = vmatprep.subr.bf16.mxu1 %v2287_v13  ;;  %v2303_v24 = vld [vmem:[#allocation2 + $0x24] ss:$16 sps:$4 sm:$0xff]   ;;  %v2307_v26 = vld [vmem:[#allocation2 + $0x20] ss:$16 sps:$4 sm:$0xff]  }
  0x1b   :  { %v2305_v25 = vld [vmem:[#allocation2 + $0x224] ss:$16 sps:$4 sm:$0xff]   ;;  %v2308_v27 = vld [vmem:[#allocation2 + $0x220] ss:$16 sps:$4 sm:$0xff]  }
  0x1c   :  { %1264 = vmatpush1.bf16.msra.mxu0 %v2289_v14  ;;  %v2309_v28 = vld [vmem:[#allocation2 + $0x4] ss:$16 sps:$4 sm:$0xff]   ;;  %v2313_v30 = vld [vmem:[#allocation2] ss:$16 sps:$4 sm:$0xff]  }
  0x1d   :  { %1305 = vmatpush1.bf16.msra.mxu1 %v2290_v15  ;;  %1265 = vmatprep.subr.bf16.mxu0 %v2291_v16  ;;  %v2311_v29 = vld [vmem:[#allocation2 + $0x204] ss:$16 sps:$4 sm:$0xff]   ;;  %v2314_v31 = vld [vmem:[#allocation2 + $0x200] ss:$16 sps:$4 sm:$0xff]   ;;  %v2369_v15 = vld [vmem:[#allocation2 + $0xec] ss:$16 sps:$4 sm:$0xff]  }
  0x1e   :  { %1306 = vmatprep.subr.bf16.mxu1 %v2293_v17  ;;  %v2315_v32 = vld [vmem:[#allocation2 + $0x1e4] ss:$16 sps:$4 sm:$0xff]   ;;  %v2319_v34 = vld [vmem:[#allocation2 + $0x1e0] ss:$16 sps:$4 sm:$0xff]  }
  0x1f   :  { %v2317_v33 = vld [vmem:[#allocation2 + $0x3e4] ss:$16 sps:$4 sm:$0xff]   ;;  %v2320_v35 = vld [vmem:[#allocation2 + $0x3e0] ss:$16 sps:$4 sm:$0xff]  }
  0x20   :  { %1266 = vmatpush1.bf16.msra.mxu0 %v2295_v18  ;;  %v2321_v39 = vld [vmem:[#allocation2 + $0x1c4] ss:$16 sps:$4 sm:$0xff]   ;;  %v2325_v41 = vld [vmem:[#allocation2 + $0x1c0] ss:$16 sps:$4 sm:$0xff]  }
  0x21   :  { %1307 = vmatpush1.bf16.msra.mxu1 %v2296_v19  ;;  %1267 = vmatprep.subr.bf16.mxu0 %v2297_v20  ;;  %v2323_v40 = vld [vmem:[#allocation2 + $0x3c4] ss:$16 sps:$4 sm:$0xff]   ;;  %v2326_v44 = vld [vmem:[#allocation2 + $0x3c0] ss:$16 sps:$4 sm:$0xff]   ;;  %v2367_v19 = vld [vmem:[#allocation2 + $0xe8] ss:$16 sps:$4 sm:$0xff]  }
  0x22   :  { %1308 = vmatprep.subr.bf16.mxu1 %v2299_v21  ;;  %v2327_v45 = vld [vmem:[#allocation2 + $0x1a4] ss:$16 sps:$4 sm:$0xff]   ;;  %v2331_v47 = vld [vmem:[#allocation2 + $0x1a0] ss:$16 sps:$4 sm:$0xff]   ;;  %v2375_v21 = vld [vmem:[#allocation2 + $0xcc] ss:$16 sps:$4 sm:$0xff]  }
  0x23   :  { %v2329_v46 = vld [vmem:[#allocation2 + $0x3a4] ss:$16 sps:$4 sm:$0xff]   ;;  %v2332_v48 = vld [vmem:[#allocation2 + $0x3a0] ss:$16 sps:$4 sm:$0xff]  }
  0x24   :  { %1268 = vmatpush1.bf16.msra.mxu0 %v2301_v22  ;;  %v2333_v50 = vld [vmem:[#allocation2 + $0x184] ss:$16 sps:$4 sm:$0xff]   ;;  %v2337_v53 = vld [vmem:[#allocation2 + $0x180] ss:$16 sps:$4 sm:$0xff]  }
  0x25   :  { %1309 = vmatpush1.bf16.msra.mxu1 %v2302_v23  ;;  %1269 = vmatprep.subr.bf16.mxu0 %v2303_v24  ;;  %v2335_v51 = vld [vmem:[#allocation2 + $0x384] ss:$16 sps:$4 sm:$0xff]   ;;  %v2338_v56 = vld [vmem:[#allocation2 + $0x380] ss:$16 sps:$4 sm:$0xff]   ;;  %v2373_v23 = vld [vmem:[#allocation2 + $0xc8] ss:$16 sps:$4 sm:$0xff]  }
  0x26   :  { %1310 = vmatprep.subr.bf16.mxu1 %v2305_v25  ;;  %v42_v52 = vld [vmem:[%s2853_s0] sm:$0xff]  ;;  %v2381_v25 = vld [vmem:[#allocation2 + $0xac] ss:$16 sps:$4 sm:$0xff]  }
  0x27   :  { %v53_v54 = vrot.slane %v42_v52, %v52_v49  ;;  %v46_v55 = vcombine.high %v42_v52, %v42_v52  ;;  %v2339_v57 = vld [vmem:[#allocation2 + $0x164] ss:$16 sps:$4 sm:$0xff]   ;;  %v2343_v61 = vld [vmem:[#allocation2 + $0x160] ss:$16 sps:$4 sm:$0xff]  }
  0x28   :  { %1270 = vmatpush1.bf16.msra.mxu0 %v2307_v26  ;;  %v2341_v58 = vld [vmem:[#allocation2 + $0x364] ss:$16 sps:$4 sm:$0xff]   ;;  %v2344_v0 = vld [vmem:[#allocation2 + $0x360] ss:$16 sps:$4 sm:$0xff]  }
  0x29   :  { %1311 = vmatpush1.bf16.msra.mxu1 %v2308_v27  ;;  %1271 = vmatprep.subr.bf16.mxu0 %v2309_v28  ;;  %v61_v59 = vcombine.high %v53_v54, %v53_v54  ;;  %v60_v60 = vrot.slane %v46_v55, %v52_v49  ;;  %v2345_v1 = vld [vmem:[#allocation2 + $0x144] ss:$16 sps:$4 sm:$0xff]   ;;  %v2349_v4 = vld [vmem:[#allocation2 + $0x140] ss:$16 sps:$4 sm:$0xff]   ;;  %v2691_v16 = vpack.c.bf16 %v53_v54, %v53_v54  ;;  %v2379_v27 = vld [vmem:[#allocation2 + $0xa8] ss:$16 sps:$4 sm:$0xff]  }
  0x2a   :  { %1312 = vmatprep.subr.bf16.mxu1 %v2311_v29  ;;  %v2347_v2 = vld [vmem:[#allocation2 + $0x344] ss:$16 sps:$4 sm:$0xff]   ;;  %v2350_v5 = vld [vmem:[#allocation2 + $0x340] ss:$16 sps:$4 sm:$0xff]   ;;  %v2387_v29 = vld [vmem:[#allocation2 + $0x8c] ss:$16 sps:$4 sm:$0xff]  }
  0x2b   :  { %v78_v62 = vpack.c.bf16 %v61_v59, %v61_v59  ;;  %v62_v63 = vcombine.high %v60_v60, %v60_v60  ;;  %v2351_v6 = vld [vmem:[#allocation2 + $0x124] ss:$16 sps:$4 sm:$0xff]   ;;  %v2355_v8 = vld [vmem:[#allocation2 + $0x120] ss:$16 sps:$4 sm:$0xff]   ;;  %v2693_v17 = vpack.c.bf16 %v60_v60, %v60_v60  ;;  %v2415_v55 = vld [vmem:[#allocation2 + $0x1e8] ss:$16 sps:$4 sm:$0xff]  }
  0x2c   :  { %1272 = vmatpush1.bf16.msra.mxu0 %v2313_v30  ;;  %v2353_v7 = vld [vmem:[#allocation2 + $0x324] ss:$16 sps:$4 sm:$0xff]   ;;  %v2356_v9 = vld [vmem:[#allocation2 + $0x320] ss:$16 sps:$4 sm:$0xff]   ;;  %v2421_v59 = vld [vmem:[#allocation2 + $0x1c8] ss:$16 sps:$4 sm:$0xff]  }
  0x2d   :  { %1313 = vmatpush1.bf16.msra.mxu1 %v2314_v31  ;;  %1273 = vmatprep.subr.bf16.mxu0 %v2315_v32  ;;  %v2688_v3 = vpack.c.bf16 %v62_v63, %v62_v63  ;;  %v2357_v10 = vld [vmem:[#allocation2 + $0x104] ss:$16 sps:$4 sm:$0xff]   ;;  %v2361_v12 = vld [vmem:[#allocation2 + $0x100] ss:$16 sps:$4 sm:$0xff]   ;;  %v2385_v31 = vld [vmem:[#allocation2 + $0x88] ss:$16 sps:$4 sm:$0xff]  }
  0x2e   :  { %1314 = vmatprep.subr.bf16.mxu1 %v2317_v33  ;;  %1289 = vmatprep.mubr.bf16.mxu0 %v78_v62  ;;  %v2359_v11 = vld [vmem:[#allocation2 + $0x304] ss:$16 sps:$4 sm:$0xff]   ;;  %v2362_v13 = vld [vmem:[#allocation2 + $0x300] ss:$16 sps:$4 sm:$0xff]   ;;  %v2393_v33 = vld [vmem:[#allocation2 + $0x6c] ss:$16 sps:$4 sm:$0xff]  }
  0x2f   :  { %1330 = vmatprep.mubr.bf16.mxu1 %v2688_v3  ;;  %v2366_v14 = vld [vmem:[#allocation2 + $0x4e4] ss:$16 sps:$4 sm:$0xff]   ;;  %v2364_v18 = vld [vmem:[#allocation2 + $0x4e0] ss:$16 sps:$4 sm:$0xff]   ;;  %v2427_v63 = vld [vmem:[#allocation2 + $0x1a8] ss:$16 sps:$4 sm:$0xff]  }
  0x30   :  { %1274 = vmatpush2.bf16.msra.mxu0 %v2319_v34  ;;  %v2372_v20 = vld [vmem:[#allocation2 + $0x4c4] ss:$16 sps:$4 sm:$0xff]   ;;  %v2370_v22 = vld [vmem:[#allocation2 + $0x4c0] ss:$16 sps:$4 sm:$0xff]  }
  0x31   :  { %1315 = vmatpush2.bf16.msra.mxu1 %v2320_v35  ;;  %1275 = vmatprep.subr.bf16.mxu0 %v2321_v39  ;;  %v2378_v24 = vld [vmem:[#allocation2 + $0x4a4] ss:$16 sps:$4 sm:$0xff]   ;;  %v2376_v26 = vld [vmem:[#allocation2 + $0x4a0] ss:$16 sps:$4 sm:$0xff]   ;;  %v2391_v35 = vld [vmem:[#allocation2 + $0x68] ss:$16 sps:$4 sm:$0xff]  }
  0x32   :  { %1316 = vmatprep.subr.bf16.mxu1 %v2323_v40  ;;  %v2384_v28 = vld [vmem:[#allocation2 + $0x484] ss:$16 sps:$4 sm:$0xff]   ;;  %v2382_v30 = vld [vmem:[#allocation2 + $0x480] ss:$16 sps:$4 sm:$0xff]   ;;  %v2397_v39 = vld [vmem:[#allocation2 + $0x48] ss:$16 sps:$4 sm:$0xff]  }
  0x33   :  { %v2390_v32 = vld [vmem:[#allocation2 + $0x464] ss:$16 sps:$4 sm:$0xff]   ;;  %v2388_v34 = vld [vmem:[#allocation2 + $0x460] ss:$16 sps:$4 sm:$0xff]  }
  0x34   :  { %1276 = vmatpush2.bf16.msra.mxu0 %v2325_v41  ;;  %v2396_v36 = vld [vmem:[#allocation2 + $0x444] ss:$16 sps:$4 sm:$0xff]   ;;  %v2394_v38 = vld [vmem:[#allocation2 + $0x440] ss:$16 sps:$4 sm:$0xff]   ;;  %v2405_v41 = vld [vmem:[#allocation2 + $0x2c] ss:$16 sps:$4 sm:$0xff]  }
  0x35   :  { %1317 = vmatpush2.bf16.msra.mxu1 %v2326_v44  ;;  %1277 = vmatprep.subr.bf16.mxu0 %v2327_v45  ;;  %v2402_v40 = vld [vmem:[#allocation2 + $0x424] ss:$16 sps:$4 sm:$0xff]   ;;  %v2700_v42 = vld.sshfl [vmem:[%s2853_s0 + $0x8] sm:$0x33 pattern:$0x76325410] }
  0x36   :  { %1318 = vmatprep.subr.bf16.mxu1 %v2329_v46  ;;  %v70_v44 = vcombine.high %v2700_v42, %v2700_v42  ;;  %v2400_v45 = vld [vmem:[#allocation2 + $0x420] ss:$16 sps:$4 sm:$0xff]   ;;  %v2403_v46 = vld [vmem:[#allocation2 + $0x28] ss:$16 sps:$4 sm:$0xff]   ;;  %v2414_v52 = vld [vmem:[#allocation2 + $0x5e4] ss:$16 sps:$4 sm:$0xff]  }
  0x37   :  { %v2412_v54 = vld [vmem:[#allocation2 + $0x5e0] ss:$16 sps:$4 sm:$0xff]   ;;  %v2426_v60 = vld [vmem:[#allocation2 + $0x5a4] ss:$16 sps:$4 sm:$0xff]  }
  0x38   :  { %1278 = vmatpush2.bf16.msra.mxu0 %v2331_v47  ;;  %v2408_v47 = vld [vmem:[#allocation2 + $0x404] ss:$16 sps:$4 sm:$0xff]   ;;  %v2704_v49 = vpack.c.bf16 %v70_v44, %v70_v44  ;;  %v2492_v44 = vld [vmem:[#allocation2 + $0x24c] ss:$16 sps:$4 sm:$0xff]  }
  0x39   :  { %1319 = vmatpush2.bf16.msra.mxu1 %v2332_v48  ;;  %1279 = vmatprep.subr.bf16.mxu0 %v2333_v50  ;;  %v2411_v48 = vld [vmem:[#allocation2 + $0xc] ss:$16 sps:$4 sm:$0xff]   ;;  %v2406_v50 = vld [vmem:[#allocation2 + $0x400] ss:$16 sps:$4 sm:$0xff]  }
  0x3a   :  { %1320 = vmatprep.subr.bf16.mxu1 %v2335_v51  ;;  %v2409_v51 = vld [vmem:[#allocation2 + $0x8] ss:$16 sps:$4 sm:$0xff]  }
  0x3c   :  { %1280 = vmatpush2.bf16.msra.mxu0 %v2337_v53  ;;  %v2417_v53 = vld [vmem:[#allocation2 + $0x1ec] ss:$16 sps:$4 sm:$0xff]  }
  0x3d   :  { %1321 = vmatpush2.bf16.msra.mxu1 %v2338_v56  ;;  %1281 = vmatprep.subr.bf16.mxu0 %v2339_v57  ;;  %v2420_v56 = vld [vmem:[#allocation2 + $0x5c4] ss:$16 sps:$4 sm:$0xff]   ;;  %v2423_v57 = vld [vmem:[#allocation2 + $0x1cc] ss:$16 sps:$4 sm:$0xff]  }
  0x3e   :  { %1322 = vmatprep.subr.bf16.mxu1 %v2341_v58  ;;  %v2418_v58 = vld [vmem:[#allocation2 + $0x5c0] ss:$16 sps:$4 sm:$0xff]  }
  0x40   :  { %1282 = vmatpush2.bf16.msra.mxu0 %v2343_v61  ;;  %v2429_v61 = vld [vmem:[#allocation2 + $0x1ac] ss:$16 sps:$4 sm:$0xff]  }
  0x41   :  { %1323 = vmatpush2.bf16.msra.mxu1 %v2344_v0  ;;  %1283 = vmatprep.subr.bf16.mxu0 %v2345_v1  ;;  %v2432_v0 = vld [vmem:[#allocation2 + $0x584] ss:$16 sps:$4 sm:$0xff]   ;;  %v2435_v1 = vld [vmem:[#allocation2 + $0x18c] ss:$16 sps:$4 sm:$0xff]  }
  0x42   :  { %1324 = vmatprep.subr.bf16.mxu1 %v2347_v2  ;;  %v2430_v2 = vld [vmem:[#allocation2 + $0x580] ss:$16 sps:$4 sm:$0xff]  }
  0x44   :  { %1284 = vmatpush2.bf16.msra.mxu0 %v2349_v4  ;;  %v2433_v4 = vld [vmem:[#allocation2 + $0x188] ss:$16 sps:$4 sm:$0xff]  }
  0x45   :  { %1325 = vmatpush2.bf16.msra.mxu1 %v2350_v5  ;;  %1285 = vmatprep.subr.bf16.mxu0 %v2351_v6  ;;  %v2438_v5 = vld [vmem:[#allocation2 + $0x564] ss:$16 sps:$4 sm:$0xff]   ;;  %v2441_v6 = vld [vmem:[#allocation2 + $0x16c] ss:$16 sps:$4 sm:$0xff]  }
  0x46   :  { %1326 = vmatprep.subr.bf16.mxu1 %v2353_v7  ;;  %v2436_v7 = vld [vmem:[#allocation2 + $0x560] ss:$16 sps:$4 sm:$0xff]  }
  0x48   :  { %1286 = vmatpush2.bf16.msra.mxu0 %v2355_v8  ;;  %v2439_v8 = vld [vmem:[#allocation2 + $0x168] ss:$16 sps:$4 sm:$0xff]  }
  0x49   :  { %1327 = vmatpush2.bf16.msra.mxu1 %v2356_v9  ;;  %1287 = vmatprep.subr.bf16.mxu0 %v2357_v10  ;;  %v2444_v9 = vld [vmem:[#allocation2 + $0x544] ss:$16 sps:$4 sm:$0xff]   ;;  %v2447_v10 = vld [vmem:[#allocation2 + $0x14c] ss:$16 sps:$4 sm:$0xff]  }
  0x4a   :  { %1328 = vmatprep.subr.bf16.mxu1 %v2359_v11  ;;  %v2442_v11 = vld [vmem:[#allocation2 + $0x540] ss:$16 sps:$4 sm:$0xff]  }
  0x4c   :  { %1288 = vmatpush2.bf16.msra.mxu0 %v2361_v12  ;;  %v2445_v12 = vld [vmem:[#allocation2 + $0x148] ss:$16 sps:$4 sm:$0xff]  }
  0x4d   :  { %1329 = vmatpush2.bf16.msra.mxu1 %v2362_v13  ;;  %1339 = vmatprep.subr.bf16.mxu0 %v2366_v14  ;;  %v2450_v13 = vld [vmem:[#allocation2 + $0x524] ss:$16 sps:$4 sm:$0xff]   ;;  %v2453_v14 = vld [vmem:[#allocation2 + $0x12c] ss:$16 sps:$4 sm:$0xff]  }
  0x4e   :  { %1380 = vmatprep.subr.bf16.mxu1 %v2369_v15  ;;  %v2448_v15 = vld [vmem:[#allocation2 + $0x520] ss:$16 sps:$4 sm:$0xff]  }
  0x4f   :  { %1290 = vmatmul.mubr.bf16.vlgmr.msra.gmra.mxu0 %v2691_v16 }
  0x50   :  { %1331 = vmatmul.mubr.bf16.vlgmr.msra.gmra.mxu1 %v2693_v17  ;;  %1340 = vmatpush1.bf16.msra.mxu0 %v2364_v18  ;;  %v2451_v18 = vld [vmem:[#allocation2 + $0x128] ss:$16 sps:$4 sm:$0xff]  }
  0x51   :  { %1381 = vmatpush1.bf16.msra.mxu1 %v2367_v19  ;;  %1341 = vmatprep.subr.bf16.mxu0 %v2372_v20  ;;  %v2456_v19 = vld [vmem:[#allocation2 + $0x504] ss:$16 sps:$4 sm:$0xff]   ;;  %v2459_v20 = vld [vmem:[#allocation2 + $0x10c] ss:$16 sps:$4 sm:$0xff]  }
  0x52   :  { %1382 = vmatprep.subr.bf16.mxu1 %v2375_v21  ;;  %1412 = vmatprep.mubr.bf16.mxu1 %v78_v62  ;;  %v2424_v62 = vld [vmem:[#allocation2 + $0x5a0] ss:$16 sps:$4 sm:$0xff]  }
  0x53   :  { %1371 = vmatprep.mubr.bf16.mxu0 %v2704_v49  ;;  %v2454_v21 = vld [vmem:[#allocation2 + $0x500] ss:$16 sps:$4 sm:$0xff]  }
  0x54   :  { %1342 = vmatpush1.bf16.msra.mxu0 %v2370_v22  ;;  %v2457_v22 = vld [vmem:[#allocation2 + $0x108] ss:$16 sps:$4 sm:$0xff]  }
  0x55   :  { %1383 = vmatpush1.bf16.msra.mxu1 %v2373_v23  ;;  %1343 = vmatprep.subr.bf16.mxu0 %v2378_v24  ;;  %v2462_v23 = vld [vmem:[#allocation2 + $0x2ec] ss:$16 sps:$4 sm:$0xff]  }
  0x56   :  { %1384 = vmatprep.subr.bf16.mxu1 %v2381_v25  ;;  %v2465_v24 = vld [vmem:[#allocation2 + $0x4ec] ss:$16 sps:$4 sm:$0xff]   ;;  %v2709_v25 = vpack.c.bf16 %v2700_v42, %v2700_v42  ;;  %v2487_v42 = vld [vmem:[#allocation2 + $0x468] ss:$16 sps:$4 sm:$0xff]  }
  0x58   :  { %1344 = vmatpush1.bf16.msra.mxu0 %v2376_v26  ;;  %v2460_v26 = vld [vmem:[#allocation2 + $0x2e8] ss:$16 sps:$4 sm:$0xff]  }
  0x59   :  { %1385 = vmatpush1.bf16.msra.mxu1 %v2379_v27  ;;  %1345 = vmatprep.subr.bf16.mxu0 %v2384_v28  ;;  %v2463_v27 = vld [vmem:[#allocation2 + $0x4e8] ss:$16 sps:$4 sm:$0xff]   ;;  %v2468_v28 = vld [vmem:[#allocation2 + $0x2cc] ss:$16 sps:$4 sm:$0xff]  }
  0x5a   :  { %1386 = vmatprep.subr.bf16.mxu1 %v2387_v29  ;;  %v2471_v29 = vld [vmem:[#allocation2 + $0x4cc] ss:$16 sps:$4 sm:$0xff]  }
  0x5c   :  { %1346 = vmatpush1.bf16.msra.mxu0 %v2382_v30  ;;  %v2466_v30 = vld [vmem:[#allocation2 + $0x2c8] ss:$16 sps:$4 sm:$0xff]  }
  0x5d   :  { %1387 = vmatpush1.bf16.msra.mxu1 %v2385_v31  ;;  %1347 = vmatprep.subr.bf16.mxu0 %v2390_v32  ;;  %v2469_v31 = vld [vmem:[#allocation2 + $0x4c8] ss:$16 sps:$4 sm:$0xff]   ;;  %v2474_v32 = vld [vmem:[#allocation2 + $0x2ac] ss:$16 sps:$4 sm:$0xff]  }
  0x5e   :  { %1388 = vmatprep.subr.bf16.mxu1 %v2393_v33  ;;  %v2477_v33 = vld [vmem:[#allocation2 + $0x4ac] ss:$16 sps:$4 sm:$0xff]  }
  0x60   :  { %1348 = vmatpush1.bf16.msra.mxu0 %v2388_v34  ;;  %v2472_v34 = vld [vmem:[#allocation2 + $0x2a8] ss:$16 sps:$4 sm:$0xff]  }
  0x61   :  { %1389 = vmatpush1.bf16.msra.mxu1 %v2391_v35  ;;  %1349 = vmatprep.subr.bf16.mxu0 %v2396_v36  ;;  %v2475_v35 = vld [vmem:[#allocation2 + $0x4a8] ss:$16 sps:$4 sm:$0xff]   ;;  %v2480_v36 = vld [vmem:[#allocation2 + $0x28c] ss:$16 sps:$4 sm:$0xff]  }
  0x62   :  { %1390 = vmatprep.subr.bf16.mxu1 %v2399_v37  ;;  %v2483_v37 = vld [vmem:[#allocation2 + $0x48c] ss:$16 sps:$4 sm:$0xff]  }
  0x64   :  { %1350 = vmatpush1.bf16.msra.mxu0 %v2394_v38  ;;  %v2478_v38 = vld [vmem:[#allocation2 + $0x288] ss:$16 sps:$4 sm:$0xff]  }
  0x65   :  { %1391 = vmatpush1.bf16.msra.mxu1 %v2397_v39  ;;  %1351 = vmatprep.subr.bf16.mxu0 %v2402_v40  ;;  %v2486_v39 = vld [vmem:[#allocation2 + $0x26c] ss:$16 sps:$4 sm:$0xff]  }
  0x66   :  { %1392 = vmatprep.subr.bf16.mxu1 %v2405_v41  ;;  %v2489_v40 = vld [vmem:[#allocation2 + $0x46c] ss:$16 sps:$4 sm:$0xff]   ;;  %v2484_v41 = vld [vmem:[#allocation2 + $0x268] ss:$16 sps:$4 sm:$0xff]  }
  0x68   :  { %1352 = vmatpush1.bf16.msra.mxu0 %v2400_v45  ;;  %v2490_v45 = vld [vmem:[#allocation2 + $0x248] ss:$16 sps:$4 sm:$0xff]  }
  0x69   :  { %1393 = vmatpush1.bf16.msra.mxu1 %v2403_v46  ;;  %1353 = vmatprep.subr.bf16.mxu0 %v2408_v47  ;;  %v2493_v46 = vld [vmem:[#allocation2 + $0x448] ss:$16 sps:$4 sm:$0xff]   ;;  %v2498_v47 = vld [vmem:[#allocation2 + $0x22c] ss:$16 sps:$4 sm:$0xff]  }
  0x6a   :  { %1394 = vmatprep.subr.bf16.mxu1 %v2411_v48  ;;  %v2501_v48 = vld [vmem:[#allocation2 + $0x42c] ss:$16 sps:$4 sm:$0xff]  }
  0x6c   :  { %1354 = vmatpush1.bf16.msra.mxu0 %v2406_v50  ;;  %v2499_v50 = vld [vmem:[#allocation2 + $0x428] ss:$16 sps:$4 sm:$0xff]  }
  0x6d   :  { %1395 = vmatpush1.bf16.msra.mxu1 %v2409_v51  ;;  %1355 = vmatprep.subr.bf16.mxu0 %v2414_v52  ;;  %v2504_v51 = vld [vmem:[#allocation2 + $0x20c] ss:$16 sps:$4 sm:$0xff]  }
  0x6e   :  { %1396 = vmatprep.subr.bf16.mxu1 %v2417_v53  ;;  %v2507_v52 = vld [vmem:[#allocation2 + $0x40c] ss:$16 sps:$4 sm:$0xff]   ;;  %v2502_v53 = vld [vmem:[#allocation2 + $0x208] ss:$16 sps:$4 sm:$0xff]  }
  0x70   :  { %1356 = vmatpush2.bf16.msra.mxu0 %v2412_v54  ;;  %v2505_v54 = vld [vmem:[#allocation2 + $0x408] ss:$16 sps:$4 sm:$0xff]  }
  0x71   :  { %1397 = vmatpush2.bf16.msra.mxu1 %v2415_v55  ;;  %1357 = vmatprep.subr.bf16.mxu0 %v2420_v56  ;;  %v2510_v55 = vld [vmem:[#allocation2 + $0x3ec] ss:$16 sps:$4 sm:$0xff]  }
  0x72   :  { %1398 = vmatprep.subr.bf16.mxu1 %v2423_v57  ;;  %v2513_v56 = vld [vmem:[#allocation2 + $0x5ec] ss:$16 sps:$4 sm:$0xff]   ;;  %v2508_v57 = vld [vmem:[#allocation2 + $0x3e8] ss:$16 sps:$4 sm:$0xff]  }
  0x74   :  { %1358 = vmatpush2.bf16.msra.mxu0 %v2418_v58  ;;  %v2511_v58 = vld [vmem:[#allocation2 + $0x5e8] ss:$16 sps:$4 sm:$0xff]  }
  0x75   :  { %1399 = vmatpush2.bf16.msra.mxu1 %v2421_v59  ;;  %1359 = vmatprep.subr.bf16.mxu0 %v2426_v60  ;;  %v2516_v59 = vld [vmem:[#allocation2 + $0x3cc] ss:$16 sps:$4 sm:$0xff]  }
  0x76   :  { %1400 = vmatprep.subr.bf16.mxu1 %v2429_v61  ;;  %v2519_v60 = vld [vmem:[#allocation2 + $0x5cc] ss:$16 sps:$4 sm:$0xff]   ;;  %v2514_v61 = vld [vmem:[#allocation2 + $0x3c8] ss:$16 sps:$4 sm:$0xff]  }
  0x78   :  { %1360 = vmatpush2.bf16.msra.mxu0 %v2424_v62  ;;  %v2517_v62 = vld [vmem:[#allocation2 + $0x5c8] ss:$16 sps:$4 sm:$0xff]  }
  0x79   :  { %1401 = vmatpush2.bf16.msra.mxu1 %v2427_v63  ;;  %1361 = vmatprep.subr.bf16.mxu0 %v2432_v0  ;;  %v2522_v63 = vld [vmem:[#allocation2 + $0x3ac] ss:$16 sps:$4 sm:$0xff]  }
  0x7a   :  { %1402 = vmatprep.subr.bf16.mxu1 %v2435_v1  ;;  %v2525_v0 = vld [vmem:[#allocation2 + $0x5ac] ss:$16 sps:$4 sm:$0xff]   ;;  %v2520_v1 = vld [vmem:[#allocation2 + $0x3a8] ss:$16 sps:$4 sm:$0xff]  }
  0x7c   :  { %1362 = vmatpush2.bf16.msra.mxu0 %v2430_v2  ;;  %v2523_v2 = vld [vmem:[#allocation2 + $0x5a8] ss:$16 sps:$4 sm:$0xff]  }
  0x7d   :  { %1403 = vmatpush2.bf16.msra.mxu1 %v2433_v4  ;;  %1363 = vmatprep.subr.bf16.mxu0 %v2438_v5  ;;  %v2528_v4 = vld [vmem:[#allocation2 + $0x38c] ss:$16 sps:$4 sm:$0xff]  }
  0x7e   :  { %1404 = vmatprep.subr.bf16.mxu1 %v2441_v6  ;;  %v2531_v5 = vld [vmem:[#allocation2 + $0x58c] ss:$16 sps:$4 sm:$0xff]   ;;  %v2526_v6 = vld [vmem:[#allocation2 + $0x388] ss:$16 sps:$4 sm:$0xff]  }
  0x80   :  { %1364 = vmatpush2.bf16.msra.mxu0 %v2436_v7  ;;  %v2529_v7 = vld [vmem:[#allocation2 + $0x588] ss:$16 sps:$4 sm:$0xff]  }
  0x81   :  { %1405 = vmatpush2.bf16.msra.mxu1 %v2439_v8  ;;  %1365 = vmatprep.subr.bf16.mxu0 %v2444_v9  ;;  %v2534_v8 = vld [vmem:[#allocation2 + $0x36c] ss:$16 sps:$4 sm:$0xff]  }
  0x82   :  { %1406 = vmatprep.subr.bf16.mxu1 %v2447_v10  ;;  %v2537_v9 = vld [vmem:[#allocation2 + $0x56c] ss:$16 sps:$4 sm:$0xff]   ;;  %v2532_v10 = vld [vmem:[#allocation2 + $0x368] ss:$16 sps:$4 sm:$0xff]  }
  0x84   :  { %1366 = vmatpush2.bf16.msra.mxu0 %v2442_v11  ;;  %v2535_v11 = vld [vmem:[#allocation2 + $0x568] ss:$16 sps:$4 sm:$0xff]  }
  0x85   :  { %1407 = vmatpush2.bf16.msra.mxu1 %v2445_v12  ;;  %1367 = vmatprep.subr.bf16.mxu0 %v2450_v13  ;;  %v2540_v12 = vld [vmem:[#allocation2 + $0x34c] ss:$16 sps:$4 sm:$0xff]  }
  0x86   :  { %1408 = vmatprep.subr.bf16.mxu1 %v2453_v14  ;;  %v2543_v13 = vld [vmem:[#allocation2 + $0x54c] ss:$16 sps:$4 sm:$0xff]   ;;  %v2538_v14 = vld [vmem:[#allocation2 + $0x348] ss:$16 sps:$4 sm:$0xff]  }
  0x88   :  { %1368 = vmatpush2.bf16.msra.mxu0 %v2448_v15  ;;  %v2541_v15 = vld [vmem:[#allocation2 + $0x548] ss:$16 sps:$4 sm:$0xff]  }
  0x89   :  { %1409 = vmatpush2.bf16.msra.mxu1 %v2451_v18  ;;  %1369 = vmatprep.subr.bf16.mxu0 %v2456_v19  ;;  %v2546_v18 = vld [vmem:[#allocation2 + $0x32c] ss:$16 sps:$4 sm:$0xff]  }
  0x8a   :  { %1410 = vmatprep.subr.bf16.mxu1 %v2459_v20  ;;  %v2549_v19 = vld [vmem:[#allocation2 + $0x52c] ss:$16 sps:$4 sm:$0xff]   ;;  %v2544_v20 = vld [vmem:[#allocation2 + $0x328] ss:$16 sps:$4 sm:$0xff]  }
  0x8c   :  { %1370 = vmatpush2.bf16.msra.mxu0 %v2454_v21  ;;  %v2547_v21 = vld [vmem:[#allocation2 + $0x528] ss:$16 sps:$4 sm:$0xff]  }
  0x8d   :  { %1411 = vmatpush2.bf16.msra.mxu1 %v2457_v22  ;;  %1421 = vmatprep.subr.bf16.mxu0 %v2462_v23  ;;  %v2552_v22 = vld [vmem:[#allocation2 + $0x30c] ss:$16 sps:$4 sm:$0xff]  }
  0x8e   :  { %1462 = vmatprep.subr.bf16.mxu1 %v2465_v24  ;;  %v2555_v23 = vld [vmem:[#allocation2 + $0x50c] ss:$16 sps:$4 sm:$0xff]   ;;  %v2550_v24 = vld [vmem:[#allocation2 + $0x308] ss:$16 sps:$4 sm:$0xff]  }
  0x8f   :  { %1372 = vmatmul.mubr.bf16.vlgmr.msra.gmra.mxu0 %v2709_v25 }
  0x90   :  { %1413 = vmatmul.mubr.bf16.vlgmr.msra.gmra.mxu1 %v2691_v16  ;;  %1422 = vmatpush1.bf16.msra.mxu0 %v2460_v26  ;;  %v2481_v16 = vld [vmem:[#allocation2 + $0x488] ss:$16 sps:$4 sm:$0xff]  }
  0x91   :  { %1463 = vmatpush1.bf16.msra.mxu1 %v2463_v27  ;;  %1423 = vmatprep.subr.bf16.mxu0 %v2468_v28  ;;  %v2553_v26 = vld [vmem:[#allocation2 + $0x508] ss:$16 sps:$4 sm:$0xff]  }
  0x92   :  { %1464 = vmatprep.subr.bf16.mxu1 %v2471_v29  ;;  %1453 = vmatprep.mubr.bf16.mxu0 %v2688_v3  ;;  %v2495_v3 = vld [vmem:[#allocation2 + $0x44c] ss:$16 sps:$4 sm:$0xff]   ;;  %v2558_v29 = vld [vmem:[%s2856_s3 + $0x70] sm:$0xff]  }
  0x93   :  { %1494 = vmatprep.mubr.bf16.mxu1 %v2704_v49  ;;  %v2496_v49 = vld [vmem:[#allocation2 + $0x228] ss:$16 sps:$4 sm:$0xff]  }
  0x94   :  { %1424 = vmatpush1.bf16.msra.mxu0 %v2466_v30  ;;  %v2556_v27 = vld [vmem:[%s2856_s3 + $0x78] sm:$0xff]   ;;  %v2559_v30 = vld [vmem:[%s2856_s3 + $0x30] sm:$0xff]  }
  0x95   :  { %1465 = vmatpush1.bf16.msra.mxu1 %v2469_v31  ;;  %1425 = vmatprep.subr.bf16.mxu0 %v2474_v32  ;;  %v2557_v28 = vld [vmem:[%s2856_s3 + $0x38] sm:$0xff]   ;;  %v2560_v31 = vld [vmem:[%s2856_s3 + $0x68] sm:$0xff]  }
  0x96   :  { %1466 = vmatprep.subr.bf16.mxu1 %v2477_v33  ;;  %v2561_v32 = vld [vmem:[%s2856_s3 + $0x28] sm:$0xff]   ;;  %v2564_v33 = vld [vmem:[%s2856_s3 + $0x58] sm:$0xff]  }
  0x98   :  { %1426 = vmatpush1.bf16.msra.mxu0 %v2472_v34  ;;  %v2572_v34 = vld [vmem:[%s2856_s3 + $0xf8] sm:$0xff]  }
  0x99   :  { %1467 = vmatpush1.bf16.msra.mxu1 %v2475_v35  ;;  %1427 = vmatprep.subr.bf16.mxu0 %v2480_v36  ;;  %v2573_v35 = vld [vmem:[%s2856_s3 + $0xb8] sm:$0xff]   ;;  %v2574_v36 = vld [vmem:[%s2856_s3 + $0xf0] sm:$0xff]  }
  0x9a   :  { %1468 = vmatprep.subr.bf16.mxu1 %v2483_v37  ;;  %v2565_v37 = vld [vmem:[%s2856_s3 + $0x18] sm:$0xff]  }
  0x9c   :  { %1428 = vmatpush1.bf16.msra.mxu0 %v2478_v38  ;;  %v2575_v38 = vld [vmem:[%s2856_s3 + $0xb0] sm:$0xff]  }
  0x9d   :  { %1469 = vmatpush1.bf16.msra.mxu1 %v2481_v16  ;;  %1429 = vmatprep.subr.bf16.mxu0 %v2486_v39  ;;  %v2566_v16 = vld [vmem:[%s2856_s3 + $0x50] sm:$0xff]   ;;  %v2576_v39 = vld [vmem:[%s2856_s3 + $0xe8] sm:$0xff]  }
  0x9e   :  { %1470 = vmatprep.subr.bf16.mxu1 %v2489_v40  ;;  %v2567_v40 = vld [vmem:[%s2856_s3 + $0x10] sm:$0xff]  }
  0xa0   :  { %1430 = vmatpush1.bf16.msra.mxu0 %v2484_v41  ;;  %v2577_v41 = vld [vmem:[%s2856_s3 + $0xa8] sm:$0xff]  }
  0xa1   :  { %1471 = vmatpush1.bf16.msra.mxu1 %v2487_v42  ;;  %1431 = vmatprep.subr.bf16.mxu0 %v2492_v44  ;;  %v2568_v42 = vld [vmem:[%s2856_s3 + $0x48] sm:$0xff]   ;;  %v2578_v44 = vld [vmem:[%s2856_s3 + $0xe0] sm:$0xff]  }
  0xa2   :  { %1472 = vmatprep.subr.bf16.mxu1 %v2495_v3  ;;  %v2569_v3 = vld [vmem:[%s2856_s3 + $0x8] sm:$0xff]  }
  0xa4   :  { %1432 = vmatpush1.bf16.msra.mxu0 %v2490_v45  ;;  %v2579_v45 = vld [vmem:[%s2856_s3 + $0xa0] sm:$0xff]  }
  0xa5   :  { %1473 = vmatpush1.bf16.msra.mxu1 %v2493_v46  ;;  %1433 = vmatprep.subr.bf16.mxu0 %v2498_v47  ;;  %v2570_v46 = vld [vmem:[%s2856_s3 + $0x40] sm:$0xff]   ;;  %v2580_v47 = vld [vmem:[%s2856_s3 + $0xd8] sm:$0xff]  }
  0xa6   :  { %1474 = vmatprep.subr.bf16.mxu1 %v2501_v48  ;;  %v2571_v48 = vld [vmem:[%s2856_s3] sm:$0xff]  }
  0xa8   :  { %1434 = vmatpush1.bf16.msra.mxu0 %v2496_v49  ;;  %v2581_v49 = vld [vmem:[%s2856_s3 + $0x98] sm:$0xff]  }
  0xa9   :  { %1475 = vmatpush1.bf16.msra.mxu1 %v2499_v50  ;;  %1435 = vmatprep.subr.bf16.mxu0 %v2504_v51  ;;  %v2582_v50 = vld [vmem:[%s2856_s3 + $0xd0] sm:$0xff]  }
  0xaa   :  { %1476 = vmatprep.subr.bf16.mxu1 %v2507_v52  ;;  %v2583_v51 = vld [vmem:[%s2856_s3 + $0x90] sm:$0xff]  }
  0xac   :  { %1436 = vmatpush1.bf16.msra.mxu0 %v2502_v53 }
  0xad   :  { %1477 = vmatpush1.bf16.msra.mxu1 %v2505_v54  ;;  %1437 = vmatprep.subr.bf16.mxu0 %v2510_v55 }
  0xae   :  { %1478 = vmatprep.subr.bf16.mxu1 %v2513_v56  ;;  %v2584_v56 = vld [vmem:[%s2856_s3 + $0xc8] sm:$0xff]  }
  0xb0   :  { %1438 = vmatpush2.bf16.msra.mxu0 %v2508_v57  ;;  %v2585_v57 = vld [vmem:[%s2856_s3 + $0x88] sm:$0xff]  }
  0xb1   :  { %1479 = vmatpush2.bf16.msra.mxu1 %v2511_v58  ;;  %1439 = vmatprep.subr.bf16.mxu0 %v2516_v59 }
  0xb2   :  { %1480 = vmatprep.subr.bf16.mxu1 %v2519_v60 }
  0xb4   :  { %1440 = vmatpush2.bf16.msra.mxu0 %v2514_v61 }
  0xb5   :  { %1481 = vmatpush2.bf16.msra.mxu1 %v2517_v62  ;;  %1441 = vmatprep.subr.bf16.mxu0 %v2522_v63  ;;  %v2586_v62 = vld [vmem:[%s2856_s3 + $0xc0] sm:$0xff]  }
  0xb6   :  { %1482 = vmatprep.subr.bf16.mxu1 %v2525_v0  ;;  %v2587_v63 = vld [vmem:[%s2856_s3 + $0x80] sm:$0xff]   ;;  %v279_v0 = vsub.s32 0, %v2682_v43 }
  0xb8   :  { %1442 = vmatpush2.bf16.msra.mxu0 %v2520_v1  ;;  %v275_v1 = vld [vmem:[%s2855_s2] sm:$0xf] }
  0xb9   :  { %1483 = vmatpush2.bf16.msra.mxu1 %v2523_v2  ;;  %1443 = vmatprep.subr.bf16.mxu0 %v2528_v4  ;;  %v283_v2 = vsub.s32 1, %v2682_v43  ;;  %v280_v4 = vrot.slane %v275_v1, %v279_v0 }
  0xba   :  { %1484 = vmatprep.subr.bf16.mxu1 %v2531_v5 }
  0xbb   :  { %v284_v5 = vrot.slane %v275_v1, %v283_v2 }
  0xbc   :  { %1444 = vmatpush2.bf16.msra.mxu0 %v2526_v6 }
  0xbd   :  { %1485 = vmatpush2.bf16.msra.mxu1 %v2529_v7  ;;  %1445 = vmatprep.subr.bf16.mxu0 %v2534_v8 }
  0xbe   :  { %1486 = vmatprep.subr.bf16.mxu1 %v2537_v9 }
  0xc0   :  { %1446 = vmatpush2.bf16.msra.mxu0 %v2532_v10 }
  0xc1   :  { %1487 = vmatpush2.bf16.msra.mxu1 %v2535_v11  ;;  %1447 = vmatprep.subr.bf16.mxu0 %v2540_v12 }
  0xc2   :  { %1488 = vmatprep.subr.bf16.mxu1 %v2543_v13 }
  0xc4   :  { %1448 = vmatpush2.bf16.msra.mxu0 %v2538_v14 }
  0xc5   :  { %1489 = vmatpush2.bf16.msra.mxu1 %v2541_v15  ;;  %1449 = vmatprep.subr.bf16.mxu0 %v2546_v18 }
  0xc6   :  { %1490 = vmatprep.subr.bf16.mxu1 %v2549_v19 }
  0xc8   :  { %1450 = vmatpush2.bf16.msra.mxu0 %v2544_v20 }
  0xc9   :  { %1491 = vmatpush2.bf16.msra.mxu1 %v2547_v21  ;;  %1451 = vmatprep.subr.bf16.mxu0 %v2552_v22 }
  0xca   :  { %1492 = vmatprep.subr.bf16.mxu1 %v2555_v23 }
  0xcc   :  { %1452 = vmatpush2.bf16.msra.mxu0 %v2550_v24 }
  0xcd   :  { %1493 = vmatpush2.bf16.msra.mxu1 %v2553_v26  ;;  %2188 = vmatprep.subr.bf16.mxu0 %v2556_v27  ;;  %v287_v27 = vsub.s32 2, %v2682_v43 }
  0xce   :  { %2210 = vmatprep.subr.bf16.mxu1 %v2572_v34 }
  0xcf   :  { %1454 = vmatmul.mubr.bf16.vlgmr.msra.gmra.mxu0 %v2693_v17  ;;  %v2562_v17 = vld [vmem:[%s2856_s3 + $0x60] sm:$0xff]  }
  0xd0   :  { %1495 = vmatmul.mubr.bf16.vlgmr.msra.gmra.mxu1 %v2709_v25  ;;  %2189 = vmatpush3.bf16.msra.mxu0 %v2557_v28  ;;  %v2563_v25 = vld [vmem:[%s2856_s3 + $0x20] sm:$0xff]   ;;  %v291_v28 = vsub.s32 3, %v2682_v43 }
  0xd1   :  { %2190 = vmatprep.subr.bf16.mxu0 %v2558_v29  ;;  %2211 = vmatpush3.bf16.msra.mxu1 %v2573_v35  ;;  %v288_v29 = vrot.slane %v275_v1, %v287_v27 }
  0xd2   :  { %2212 = vmatprep.subr.bf16.mxu1 %v2574_v36 }
  0xd4   :  { %2191 = vmatpush3.bf16.msra.mxu0 %v2559_v30  ;;  %v292_v30 = vrot.slane %v275_v1, %v291_v28 }
  0xd5   :  { %2192 = vmatprep.subr.bf16.mxu0 %v2560_v31  ;;  %2213 = vmatpush3.bf16.msra.mxu1 %v2575_v38 }
  0xd6   :  { %2214 = vmatprep.subr.bf16.mxu1 %v2576_v39 }
  0xd8   :  { %2193 = vmatpush3.bf16.msra.mxu0 %v2561_v32 }
  0xd9   :  { %2194 = vmatprep.subr.bf16.mxu0 %v2562_v17  ;;  %2215 = vmatpush3.bf16.msra.mxu1 %v2577_v41 }
  0xda   :  { %2216 = vmatprep.subr.bf16.mxu1 %v2578_v44 }
  0xdc   :  { %2195 = vmatpush3.bf16.msra.mxu0 %v2563_v25 }
  0xdd   :  { %2196 = vmatprep.subr.bf16.mxu0 %v2564_v33  ;;  %2217 = vmatpush3.bf16.msra.mxu1 %v2579_v45  ;;  %v1862_v45 = vld [vmem:[%s2858_s5 + $0x38] sm:$0xff] }
  0xde   :  { %2218 = vmatprep.subr.bf16.mxu1 %v2580_v47  ;;  %v1861_v47 = vld [vmem:[%s2858_s5 + $0x30] sm:$0xff] }
  0xe0   :  { %2197 = vmatpush3.bf16.msra.mxu0 %v2565_v37 }
  0xe1   :  { %2198 = vmatprep.subr.bf16.mxu0 %v2566_v16  ;;  %2219 = vmatpush3.bf16.msra.mxu1 %v2581_v49  ;;  %v1859_v49 = vld [vmem:[%s2858_s5 + $0x20] sm:$0xff] }
  0xe2   :  { %2220 = vmatprep.subr.bf16.mxu1 %v2582_v50  ;;  %v1858_v50 = vld [vmem:[%s2858_s5 + $0x18] sm:$0xff] }
  0xe4   :  { %2199 = vmatpush3.bf16.msra.mxu0 %v2567_v40 }
  0xe5   :  { %2200 = vmatprep.subr.bf16.mxu0 %v2568_v42  ;;  %2221 = vmatpush3.bf16.msra.mxu1 %v2583_v51  ;;  %v1857_v51 = vld [vmem:[%s2858_s5 + $0x10] sm:$0xff] }
  0xe6   :  { %2222 = vmatprep.subr.bf16.mxu1 %v2584_v56 }
  0xe8   :  { %2201 = vmatpush3.bf16.msra.mxu0 %v2569_v3 }
  0xe9   :  { %2202 = vmatprep.subr.bf16.mxu0 %v2570_v46  ;;  %2223 = vmatpush3.bf16.msra.mxu1 %v2585_v57  ;;  %v2636_v46 = vmov 0.0  }
  0xea   :  { %2224 = vmatprep.subr.bf16.mxu1 %v2586_v62 }
  0xec   :  { %2203 = vmatpush3.bf16.msra.mxu0 %v2571_v48  ;;  %v1860_v48 = vld [vmem:[%s2858_s5 + $0x28] sm:$0xff] }
  0xed   :  { %2225 = vmatpush3.bf16.msra.mxu1 %v2587_v63  ;;  %2241 = vmatprep.subr.mxu0 %v2636_v46 }
 0x10f   :  { %v1291_v52 = vpop.f32.mrf.mxu0 }
 0x110   :  { %v1332_v53 = vpop.f32.mrf.mxu1  ;;  %v1292_v6 = vadd.f32 %v1291_v52, %v280_v4  ;;  %v1856_v52 = vld [vmem:[%s2858_s5 + $0x8] sm:$0xff] }
 0x111   :  { %v1293_v54 = vpop.f32.mrf.mxu0 }
 0x112   :  { %v1334_v55 = vpop.f32.mrf.mxu1  ;;  %v1294_v7 = vadd.f32 %v1293_v54, %v284_v5  ;;  %v1333_v8 = vadd.f32 %v1332_v53, %v1292_v6  ;;  %v1855_v53 = vld [vmem:[%s2858_s5] sm:$0xff] }
 0x113   :  { %v1295_v58 = vpop.f32.mrf.mxu0  ;;  %v2186_v5 = vld [vmem:[%s2859_s6] ss:$0 sm:$0xff] }
 0x114   :  { %v1336_v59 = vpop.f32.mrf.mxu1  ;;  %v1335_v11 = vadd.f32 %v1334_v55, %v1294_v7 }
 0x115   :  { %v1296_v60 = vpop.f32.mrf.mxu0  ;;  %v2153_v59 = vld [vmem:[%s2857_s4] ss:$0 sm:$0xff]  ;;  %s2608_s4 = scalar_lea.vmem %s1952_s19, 32 }
 0x116   :  { %v1337_v61 = vpop.f32.mrf.mxu1  ;;  %p2609_p5 = scmp.ne.s32.totalorder %s1952_s19, %s2608_s4  ;;  %p2614_p7 = scmp.lt.s32.totalorder %s2608_s4, %s2608_s4 }
 0x118   :  { %p2615_p8 = por %p2614_p7, %p2613_p6 }
 0x11a   :  { %p2616_p9 = pnand %p2615_p8, %p2609_p5 }
 0x14f   :  { %v1373_v9 = vpop.f32.mrf.mxu0 }
 0x150   :  { %v1414_v10 = vpop.f32.mrf.mxu1  ;;  %v1374_v12 = vadd.f32 %v1373_v9, %v1333_v8 }
 0x151   :  { %v1375_v13 = vpop.f32.mrf.mxu0  ;;  %v1415_v31 = vadd.f32 %v1414_v10, %v288_v29 }
 0x152   :  { %v1416_v14 = vpop.f32.mrf.mxu1  ;;  %v1376_v15 = vadd.f32 %v1375_v13, %v1335_v11  ;;  %v1503_v18 = vmax.f32 %v1374_v12, 0.0 }
 0x153   :  { %v1377_v19 = vpop.f32.mrf.mxu0  ;;  %v1417_v25 = vadd.f32 %v1416_v14, %v292_v30 }
 0x154   :  { %v1418_v20 = vpop.f32.mrf.mxu1  ;;  %v1504_v21 = vmax.f32 %v1376_v15, 0.0  ;;  %v1507_v26 = vpack.c.bf16 %v1503_v18, %v1503_v18 }
 0x155   :  { %v1378_v22 = vpop.f32.mrf.mxu0 }
 0x156   :  { %v1419_v23 = vpop.f32.mrf.mxu1  ;;  %v1508_v24 = vpack.c.bf16 %v1504_v21, %v1504_v21 }
 0x158   :  { %1806 = vmatprep.mubr.bf16.mxu0 %v1508_v24 }
 0x159   :  { %1807 = vmatmul.mubr.bf16.vlgmr.msra.gmra.mxu0 %v1507_v26 }
 0x15a   :  { %2242 = vmatpush3.msra.mxu0 %v1862_v45  ;;  %2257 = vmatprep.mubr.msk.f32.mxu0 %vm2637_vm0, %v2636_v46 }
 0x15b   :  { %2243 = vmatprep.subr.mxu0 %v2636_v46 }
 0x15c   :  { %2244 = vmatpush3.msra.mxu0 %v1861_v47 }
 0x15d   :  { %2245 = vmatprep.subr.mxu0 %v2636_v46 }
 0x15e   :  { %2246 = vmatpush3.msra.mxu0 %v1860_v48 }
 0x15f   :  { %2247 = vmatprep.subr.mxu0 %v2636_v46 }
 0x160   :  { %2248 = vmatpush3.msra.mxu0 %v1859_v49 }
 0x161   :  { %2249 = vmatprep.subr.mxu0 %v2636_v46 }
 0x162   :  { %2250 = vmatpush3.msra.mxu0 %v1858_v50 }
 0x163   :  { %2251 = vmatprep.subr.mxu0 %v2636_v46 }
 0x164   :  { %2252 = vmatpush3.msra.mxu0 %v1857_v51 }
 0x165   :  { %2253 = vmatprep.subr.mxu0 %v2636_v46 }
 0x166   :  { %2254 = vmatpush3.msra.mxu0 %v1856_v52 }
 0x167   :  { %2255 = vmatprep.subr.mxu0 %v2636_v46 }
 0x168   :  { %2256 = vmatpush3.msra.mxu0 %v1855_v53 }
 0x18f   :  { %v1455_v32 = vpop.f32.mrf.mxu0 }
 0x190   :  { %v1496_v17 = vpop.f32.mrf.mxu1  ;;  %v1456_v33 = vadd.f32 %v1455_v32, %v1415_v31 }
 0x191   :  { %v1457_v34 = vpop.f32.mrf.mxu0 }
 0x192   :  { %v1498_v35 = vpop.f32.mrf.mxu1  ;;  %v1497_v36 = vadd.f32 %v1496_v17, %v1456_v33  ;;  %v1458_v37 = vadd.f32 %v1457_v34, %v1417_v25 }
 0x193   :  { %v1459_v38 = vpop.f32.mrf.mxu0 }
 0x194   :  { %v1500_v16 = vpop.f32.mrf.mxu1  ;;  %v1499_v39 = vadd.f32 %v1498_v35, %v1458_v37  ;;  %v1505_v40 = vmax.f32 %v1497_v36, 0.0 }
 0x195   :  { %v1460_v41 = vpop.f32.mrf.mxu0 }
 0x196   :  { %v1501_v42 = vpop.f32.mrf.mxu1  ;;  %v1506_v44 = vmax.f32 %v1499_v39, 0.0  ;;  %v1509_v43 = vpack.c.bf16 %v1505_v40, %v1505_v40 }
 0x198   :  { %v1510_v3 = vpack.c.bf16 %v1506_v44, %v1506_v44 }
 0x19a   :  { %1846 = vmatprep.mubr.bf16.mxu1 %v1510_v3 }
 0x19b   :  { %1847 = vmatmul.mubr.bf16.vlgmr.msra.gmra.mxu1 %v1509_v43 }
 0x219   :  { %v2204_v54 = vpop.f32.mrf.mxu0 }
 0x21b   :  { %v2205_v55 = vpop.f32.mrf.mxu0 }
 0x21c   :  { %v2206_v56 = vadd.f32 %v2205_v55, %v2204_v54 }
 0x21d   :  { %v2207_v57 = vpop.f32.mrf.mxu0 }
 0x21e   :  { %v1809_v62 = vadd.f32 %v2206_v56, %v2153_v59 }
 0x21f   :  { %v2208_v58 = vpop.f32.mrf.mxu0 }
 0x25b   :  { %v2226_v60 = vpop.f32.mrf.mxu1 }
 0x25d   :  { %v2227_v61 = vpop.f32.mrf.mxu1 }
 0x25e   :  { %v2228_v63 = vadd.f32 %v2227_v61, %v2226_v60 }
 0x25f   :  { %v2229_v0 = vpop.f32.mrf.mxu1 }
 0x260   :  { %v1849_v1 = vadd.f32 %v2228_v63, %v1809_v62 }
 0x261   :  { %v2230_v2 = vpop.f32.mrf.mxu1 }
 0x262   :  { %v1854_v4 = vmax.f32 %v1849_v1, 0.0 }
 0x264   :  { %2258 = vmatmul.mubr.msk.f32.vlgmr.msra.gmra.mxu0 %vm1870_vm1, %v1854_v4 }
 0x324   :  { %v1940_v6 = vpop.f32.mrf.mxu0 }
 0x325   :  { %v1941_v7 = vadd.f32 %v2186_v5, %v1940_v6 }
 0x326   :  { %v2259_v8 = vpop.f32.mrf.mxu0 }
 0x327   :  { %1944 = vst [vmem:[#allocation5] sm:$0x3] %v1941_v7 }
 0x328   :  { %2619 = shalt.err (!%p2616_p9)
}
 0x329   :  { %1954 = dma.vmem_to_hbm [thread:$0]  %s1952_s19, 32, %s2860_s7, [#allocation4]  }
 0x32a   :  { %2630 = dma.done.wait [#allocation4], 32  }
 0x32b   :  { %2631 = vsyncadd [#allocation4], 4294967264 }
 0x32c   :  { %1958 = vsyncpa [#allocation3], 1 }
 0x32d   :  { %1959 = vsyncpa [#allocation4], 1 }

</bundles_post_ra>
